<compile_context>
chip_gen: v7x
topology: tpu7x:2x2x1
jax: 0.10.0
libtpu: 0.0.40
codegen_flags: <defaults>
</compile_context>

<pallas_src>
import functools

import numpy as np
import jax
import jax.numpy as jnp
from jax.experimental import pallas as pl
from jax.experimental.pallas import tpu as pltpu


def make_gaussian_kernel(ksize: int = 5, sigma: float = 1.5) -> np.ndarray:
    """Deterministic KxK Gaussian kernel (what the module gets in __init__)."""
    ax = np.arange(ksize, dtype=np.float64) - (ksize - 1) / 2.0
    g = np.exp(-(ax ** 2) / (2.0 * sigma ** 2))
    k2d = np.outer(g, g)
    k2d /= k2d.sum()
    return k2d.astype(np.float32)


def _round_up(x: int, m: int) -> int:
    return (x + m - 1) // m * m


def _sep_pass(taps, load):
    """sum_i taps[i] * load(i), using two partial accumulators (breaks the
    single serial vadd chain so the VLIW packer can fill >1 VALU slot)."""
    acc0 = taps[0] * load(0)
    if len(taps) == 1:
        return acc0
    acc1 = taps[1] * load(1)
    for i in range(2, len(taps)):
        term = taps[i] * load(i)
        if i % 2 == 0:
            acc0 = acc0 + term
        else:
            acc1 = acc1 + term
    return acc0 + acc1


def _blur_kernel(x_hbm, o_ref, buf, tmp, sem, *,
                 gv, gh, TH, HIN, Wpad, LPAD, n_h):
    # x_hbm : (C, Hin_pad, Wpad) f32 raw HBM ref (memory_space=pl.ANY)
    # o_ref : (1, TH, Wpad)      f32 VMEM output tile (lane-dense, auto-pipelined)
    # buf   : (2, HIN, Wpad)     f32 VMEM double buffer for the haloed input rows
    # tmp   : (TH, Wpad+LPAD)    f32 VMEM scratch for the vertical-pass result
    # sem   : DMA semaphores, shape (2,)
    c = pl.program_id(0)          # channel
    h = pl.program_id(1)          # H tile (sequential per channel)
    slot = h % 2

    def start_fetch(hh, s):
        row0 = pl.multiple_of(hh * TH, 8)
        pltpu.make_async_copy(
            x_hbm.at[c, pl.ds(row0, HIN), :], buf.at[s], sem.at[s]).start()

    # Prime this channel's DMA chain at its first H tile (chain never crosses
    # the channel boundary, so the C axis can be megacore-parallel).
    @pl.when(h == 0)
    def _():
        start_fetch(h, slot)

    # Prefetch the next H tile of this channel into the other buffer.
    @pl.when(h + 1 < n_h)
    def _():
        start_fetch(h + 1, 1 - slot)

    # Wait for the current tile (dummy src of identical shape; same dst/sem).
    pltpu.make_async_copy(
        x_hbm.at[c, pl.ds(0, HIN), :], buf.at[slot], sem.at[slot]).wait()

    cur = buf[slot]                                   # (HIN, Wpad) value

    # Vertical K-tap pass (sublane shifts), constants folded into the FMAs.
    tmp[:, :Wpad] = _sep_pass(gv, lambda i: cur[i:i + TH, :])
    # Zero the lane-pad strip so the horizontal taps read deterministic data.
    # (Those columns only feed output columns >= Wo, which are cropped.)
    tmp[:, Wpad:] = jnp.zeros((TH, LPAD), jnp.float32)

    # Horizontal K-tap pass (lane shifts) -> full-width, unmasked stores.
    o_ref[0] = _sep_pass(gh, lambda j: tmp[:, j:j + Wpad])


def gaussian_blur(x_hwc: jnp.ndarray, kernel2d, *, tile_h=None) -> jnp.ndarray:
    H, W, C = x_hwc.shape
    assert C == 3, "reference forward assumes 3 channels"
    kernel2d = np.asarray(kernel2d, dtype=np.float64)
    K = int(kernel2d.shape[0])
    assert K % 2 == 1, "kernel size must be odd."
    assert H >= K and W >= K
    Ho, Wo = H - K + 1, W - K + 1

    # Rank-1 (separable) factorization: Gaussian kernels are outer(g, g).
    u, s, vt = np.linalg.svd(kernel2d)
    gv = u[:, 0] * np.sqrt(s[0])
    gh = vt[0, :] * np.sqrt(s[0])
    if gv.sum() < 0:
        gv, gh = -gv, -gh
    assert np.allclose(np.outer(gv, gh), kernel2d, atol=1e-6), \
        "kernel is not rank-1 separable"
    # TODO(synk): a non-separable KxK kernel would need the K*K tap path.

    Wpad = _round_up(W, 128)          # lane-dense output width
    LPAD = 128                        # lane pad for horizontal-tap overreach
    HALO = _round_up(K - 1, 8)        # row halo, rounded to sublane multiple

    def working_set(th):
        return 4 * (2 * (th + HALO) * Wpad      # input double buffer
                    + th * (Wpad + LPAD)        # vertical-pass scratch
                    + 2 * th * Wpad)            # output double buffer

    if tile_h is None:
        TH = min(256, _round_up(Ho, 8))
        while TH > 64 and working_set(TH) > (24 << 20):
            TH = max(64, _round_up(TH // 2, 8))
    else:                              # explicit override (used in tests)
        TH = max(8, _round_up(min(int(tile_h), _round_up(Ho, 8)), 8))

    n_h = -(-Ho // TH)                 # ceil(Ho / TH)
    HIN = TH + HALO                    # rows fetched per tile (halo included)
    Hin_pad = (n_h - 1) * TH + HIN     # >= H, padded rows feed cropped output
    Hout_pad = n_h * TH

    x_chw = jnp.transpose(x_hwc.astype(jnp.float32), (2, 0, 1))      # (C,H,W)
    x_chw = jnp.pad(x_chw, ((0, 0), (0, Hin_pad - H), (0, Wpad - W)))

    kern = functools.partial(
        _blur_kernel,
        gv=tuple(float(v) for v in gv),
        gh=tuple(float(v) for v in gh),
        TH=TH, HIN=HIN, Wpad=Wpad, LPAD=LPAD, n_h=n_h)

    vmem_limit = int(min(max(working_set(TH) + (8 << 20), 32 << 20), 48 << 20))

    out_chw = pl.pallas_call(
        kern,
        out_shape=jax.ShapeDtypeStruct((C, Hout_pad, Wpad), jnp.float32),
        grid_spec=pltpu.PrefetchScalarGridSpec(
            num_scalar_prefetch=0,
            grid=(C, n_h),
            in_specs=[pl.BlockSpec(memory_space=pl.ANY)],   # raw HBM, manual DMA
            out_specs=pl.BlockSpec((1, TH, Wpad), lambda c, h: (c, h, 0)),
            scratch_shapes=[
                pltpu.VMEM((2, HIN, Wpad), jnp.float32),    # input double buffer
                pltpu.VMEM((TH, Wpad + LPAD), jnp.float32), # vertical-pass scratch
                pltpu.SemaphoreType.DMA((2,)),
            ]),
        compiler_params=pltpu.CompilerParams(
            dimension_semantics=("parallel", "arbitrary"),
            vmem_limit_bytes=vmem_limit),
    )(x_chw)

    # Crop the H/W padding and return HWC like the module.
    return jnp.transpose(out_chw[:, :Ho, :Wo], (1, 2, 0))


def _reference_numpy(x_hwc: np.ndarray, kernel2d: np.ndarray) -> np.ndarray:
    """Plain numpy valid cross-correlation per channel (mirrors F.conv2d)."""
    H, W, _ = x_hwc.shape
    K = kernel2d.shape[0]
    Ho, Wo = H - K + 1, W - K + 1
    out = np.zeros((Ho, Wo, x_hwc.shape[2]), np.float32)
    for i in range(K):
        for j in range(K):
            out += np.float32(kernel2d[i, j]) * \
                x_hwc[i:i + Ho, j:j + Wo, :].astype(np.float32)
    return out


if __name__ == "__main__":
    key = jax.random.PRNGKey(0)
    k1, k2 = jax.random.split(key)
    kernel2d = make_gaussian_kernel(ksize=5, sigma=1.5)

    # Test 1: toy 16x16x3 image (single H tile).
    H, W, C = 16, 16, 3
    x = jax.random.uniform(k1, (H, W, C), dtype=jnp.float32) * 255.0
    out = jax.block_until_ready(gaussian_blur(x, kernel2d))
    assert out.shape == (H - 5 + 1, W - 5 + 1, C)
    assert out.dtype == jnp.float32
    np.testing.assert_allclose(np.asarray(out),
                               _reference_numpy(np.asarray(x), kernel2d),
                               rtol=1e-4, atol=1e-3)

    # Test 2: small multi-tile case (forces the halo'd H-tiling + DMA chain).
    H2, W2 = 32, 40
    x2 = jax.random.uniform(k2, (H2, W2, C), dtype=jnp.float32) * 255.0
    out2 = jax.block_until_ready(gaussian_blur(x2, kernel2d, tile_h=8))
    assert out2.shape == (H2 - 5 + 1, W2 - 5 + 1, C)
    np.testing.assert_allclose(np.asarray(out2),
                               _reference_numpy(np.asarray(x2), kernel2d),
                               rtol=1e-4, atol=1e-3)

    print("KERNEL_OK")
</pallas_src>

<mosaic_0001>
module attributes {stable_mosaic.version = 11 : i64} {
  func.func @_blur_kernel(%arg0: i32, %arg1: i32, %arg2: memref<3x24x128xf32, #tpu.memory_space<any>>, %arg3: memref<1x16x128xf32, #tpu.memory_space<vmem>>, %arg4: memref<2x24x128xf32, #tpu.memory_space<vmem>>, %arg5: memref<16x256xf32, #tpu.memory_space<vmem>>, %arg6: memref<2x!tpu.dma_semaphore, #tpu.memory_space<semaphore_mem>>) attributes {dimension_semantics = [#tpu.dimension_semantics<parallel>, #tpu.dimension_semantics<arbitrary>], iteration_bounds = array<i64: 3, 1>, scalar_prefetch = 0 : i64, scratch_operands = 3 : i64, tpu.core_type = #tpu.core_type<tc>, window_params = [{}, {transform_indices = @transform_1, window_bounds = array<i64: 1, 16, 128>}]} {
    %c2_i32 = arith.constant 2 : i32
    %c0_i32 = arith.constant 0 : i32
    %0 = arith.cmpi eq, %c2_i32, %c0_i32 : i32
    %c1_i32 = arith.constant 1 : i32
    %1 = arith.select %0, %c1_i32, %c2_i32 : i32
    %2 = arith.remsi %arg1, %1 : i32
    %c0_i32_0 = arith.constant 0 : i32
    %3 = arith.cmpi ne, %2, %c0_i32_0 : i32
    %c0_i32_1 = arith.constant 0 : i32
    %4 = arith.cmpi slt, %2, %c0_i32_1 : i32
    %c0_i32_2 = arith.constant 0 : i32
    %5 = arith.cmpi slt, %1, %c0_i32_2 : i32
    %6 = arith.xori %4, %5 : i1
    %7 = arith.andi %6, %3 : i1
    %8 = arith.addi %2, %1 : i32
    %9 = arith.select %7, %8, %2 : i32
    %c0_i32_3 = arith.constant 0 : i32
    %10 = arith.cmpi eq, %arg1, %c0_i32_3 : i32
    %11 = arith.extui %10 : i1 to i32
    %c0_i32_4 = arith.constant 0 : i32
    %12 = arith.cmpi ne, %11, %c0_i32_4 : i32
    scf.if %12 {
      %c16_i32 = arith.constant 16 : i32
      %70 = arith.muli %arg1, %c16_i32 : i32
      %71 = tpu.assume_multiple %70, 8 : i32
      %c0_i32_35 = arith.constant 0 : i32
      %72 = tpu.memref_slice %arg2[%arg0, %71, %c0_i32_35] : memref<3x24x128xf32, #tpu.memory_space<any>> -> memref<1x24x128xf32, #tpu.memory_space<any>>
      %73 = tpu.memref_squeeze %72 : memref<1x24x128xf32, #tpu.memory_space<any>> -> memref<24x128xf32, #tpu.memory_space<any>>
      %c0_i32_36 = arith.constant 0 : i32
      %c0_i32_37 = arith.constant 0 : i32
      %74 = tpu.memref_slice %arg4[%9, %c0_i32_36, %c0_i32_37] : memref<2x24x128xf32, #tpu.memory_space<vmem>> -> memref<1x24x128xf32, #tpu.memory_space<vmem>>
      %75 = tpu.memref_squeeze %74 : memref<1x24x128xf32, #tpu.memory_space<vmem>> -> memref<24x128xf32, #tpu.memory_space<vmem>>
      %76 = tpu.memref_slice %arg6[%9] : memref<2x!tpu.dma_semaphore, #tpu.memory_space<semaphore_mem>> -> memref<1x!tpu.dma_semaphore, #tpu.memory_space<semaphore_mem>>
      %77 = tpu.memref_squeeze %76 : memref<1x!tpu.dma_semaphore, #tpu.memory_space<semaphore_mem>> -> memref<!tpu.dma_semaphore, #tpu.memory_space<semaphore_mem>>
      tpu.enqueue_dma source(%73 : memref<24x128xf32, #tpu.memory_space<any>>) target(%75 : memref<24x128xf32, #tpu.memory_space<vmem>>) target_semaphore(%77 : memref<!tpu.dma_semaphore, #tpu.memory_space<semaphore_mem>>)
    } else {
    }
    %c1_i32_5 = arith.constant 1 : i32
    %13 = arith.addi %arg1, %c1_i32_5 : i32
    %c1_i32_6 = arith.constant 1 : i32
    %14 = arith.cmpi slt, %13, %c1_i32_6 : i32
    %15 = arith.extui %14 : i1 to i32
    %c0_i32_7 = arith.constant 0 : i32
    %16 = arith.cmpi ne, %15, %c0_i32_7 : i32
    scf.if %16 {
      %c1_i32_35 = arith.constant 1 : i32
      %70 = arith.addi %arg1, %c1_i32_35 : i32
      %c1_i32_36 = arith.constant 1 : i32
      %71 = arith.subi %c1_i32_36, %9 : i32
      %c16_i32 = arith.constant 16 : i32
      %72 = arith.muli %70, %c16_i32 : i32
      %73 = tpu.assume_multiple %72, 8 : i32
      %c0_i32_37 = arith.constant 0 : i32
      %74 = tpu.memref_slice %arg2[%arg0, %73, %c0_i32_37] : memref<3x24x128xf32, #tpu.memory_space<any>> -> memref<1x24x128xf32, #tpu.memory_space<any>>
      %75 = tpu.memref_squeeze %74 : memref<1x24x128xf32, #tpu.memory_space<any>> -> memref<24x128xf32, #tpu.memory_space<any>>
      %c0_i32_38 = arith.constant 0 : i32
      %c0_i32_39 = arith.constant 0 : i32
      %76 = tpu.memref_slice %arg4[%71, %c0_i32_38, %c0_i32_39] : memref<2x24x128xf32, #tpu.memory_space<vmem>> -> memref<1x24x128xf32, #tpu.memory_space<vmem>>
      %77 = tpu.memref_squeeze %76 : memref<1x24x128xf32, #tpu.memory_space<vmem>> -> memref<24x128xf32, #tpu.memory_space<vmem>>
      %78 = tpu.memref_slice %arg6[%71] : memref<2x!tpu.dma_semaphore, #tpu.memory_space<semaphore_mem>> -> memref<1x!tpu.dma_semaphore, #tpu.memory_space<semaphore_mem>>
      %79 = tpu.memref_squeeze %78 : memref<1x!tpu.dma_semaphore, #tpu.memory_space<semaphore_mem>> -> memref<!tpu.dma_semaphore, #tpu.memory_space<semaphore_mem>>
      tpu.enqueue_dma source(%75 : memref<24x128xf32, #tpu.memory_space<any>>) target(%77 : memref<24x128xf32, #tpu.memory_space<vmem>>) target_semaphore(%79 : memref<!tpu.dma_semaphore, #tpu.memory_space<semaphore_mem>>)
    } else {
    }
    %c0_i32_8 = arith.constant 0 : i32
    %c0_i32_9 = arith.constant 0 : i32
    %17 = tpu.memref_slice %arg2[%arg0, %c0_i32_8, %c0_i32_9] : memref<3x24x128xf32, #tpu.memory_space<any>> -> memref<1x24x128xf32, #tpu.memory_space<any>>
    %18 = tpu.memref_squeeze %17 : memref<1x24x128xf32, #tpu.memory_space<any>> -> memref<24x128xf32, #tpu.memory_space<any>>
    %c0_i32_10 = arith.constant 0 : i32
    %c0_i32_11 = arith.constant 0 : i32
    %19 = tpu.memref_slice %arg4[%9, %c0_i32_10, %c0_i32_11] : memref<2x24x128xf32, #tpu.memory_space<vmem>> -> memref<1x24x128xf32, #tpu.memory_space<vmem>>
    %20 = tpu.memref_squeeze %19 : memref<1x24x128xf32, #tpu.memory_space<vmem>> -> memref<24x128xf32, #tpu.memory_space<vmem>>
    %21 = tpu.memref_slice %arg6[%9] : memref<2x!tpu.dma_semaphore, #tpu.memory_space<semaphore_mem>> -> memref<1x!tpu.dma_semaphore, #tpu.memory_space<semaphore_mem>>
    %22 = tpu.memref_squeeze %21 : memref<1x!tpu.dma_semaphore, #tpu.memory_space<semaphore_mem>> -> memref<!tpu.dma_semaphore, #tpu.memory_space<semaphore_mem>>
    tpu.wait_dma2 semaphore(%22 : memref<!tpu.dma_semaphore, #tpu.memory_space<semaphore_mem>>) src(%18 : memref<24x128xf32, #tpu.memory_space<any>>) dst(%20 : memref<24x128xf32, #tpu.memory_space<vmem>>)
    %23 = arith.index_cast %9 : i32 to index
    %c0 = arith.constant 0 : index
    %c0_12 = arith.constant 0 : index
    %24 = vector.load %arg4[%23, %c0, %c0_12] : memref<2x24x128xf32, #tpu.memory_space<vmem>>, vector<1x24x128xf32>
    %25 = vector.shape_cast %24 : vector<1x24x128xf32> to vector<24x128xf32>
    %26 = vector.extract_strided_slice %25 {offsets = [0, 0], sizes = [16, 128], strides = [1, 1]} : vector<24x128xf32> to vector<16x128xf32>
    %cst = arith.constant 0.120078377 : f32
    %27 = vector.broadcast %cst : f32 to vector<16x128xf32>
    %28 = arith.mulf %27, %26 : vector<16x128xf32>
    %29 = vector.extract_strided_slice %25 {offsets = [1, 0], sizes = [16, 128], strides = [1, 1]} : vector<24x128xf32> to vector<16x128xf32>
    %cst_13 = arith.constant 0.233880758 : f32
    %30 = vector.broadcast %cst_13 : f32 to vector<16x128xf32>
    %31 = arith.mulf %30, %29 : vector<16x128xf32>
    %32 = vector.extract_strided_slice %25 {offsets = [2, 0], sizes = [16, 128], strides = [1, 1]} : vector<24x128xf32> to vector<16x128xf32>
    %cst_14 = arith.constant 0.292081714 : f32
    %33 = vector.broadcast %cst_14 : f32 to vector<16x128xf32>
    %34 = arith.mulf %33, %32 : vector<16x128xf32>
    %35 = arith.addf %28, %34 : vector<16x128xf32>
    %36 = vector.extract_strided_slice %25 {offsets = [3, 0], sizes = [16, 128], strides = [1, 1]} : vector<24x128xf32> to vector<16x128xf32>
    %cst_15 = arith.constant 0.233880758 : f32
    %37 = vector.broadcast %cst_15 : f32 to vector<16x128xf32>
    %38 = arith.mulf %37, %36 : vector<16x128xf32>
    %39 = arith.addf %31, %38 : vector<16x128xf32>
    %40 = vector.extract_strided_slice %25 {offsets = [4, 0], sizes = [16, 128], strides = [1, 1]} : vector<24x128xf32> to vector<16x128xf32>
    %cst_16 = arith.constant 0.120078377 : f32
    %41 = vector.broadcast %cst_16 : f32 to vector<16x128xf32>
    %42 = arith.mulf %41, %40 : vector<16x128xf32>
    %43 = arith.addf %35, %42 : vector<16x128xf32>
    %44 = arith.addf %43, %39 : vector<16x128xf32>
    %c0_17 = arith.constant 0 : index
    %c0_18 = arith.constant 0 : index
    %45 = vector.load %arg5[%c0_17, %c0_18] : memref<16x256xf32, #tpu.memory_space<vmem>>, vector<16x128xf32>
    tpu.vector_store %arg5[%c0_17, %c0_18], %44 {strides = array<i32>} : memref<16x256xf32, #tpu.memory_space<vmem>>, vector<16x128xf32>,
    %cst_19 = arith.constant 0.000000e+00 : f32
    %46 = vector.broadcast %cst_19 : f32 to vector<16x128xf32>
    %c0_20 = arith.constant 0 : index
    %c128 = arith.constant 128 : index
    %47 = vector.load %arg5[%c0_20, %c128] : memref<16x256xf32, #tpu.memory_space<vmem>>, vector<16x128xf32>
    tpu.vector_store %arg5[%c0_20, %c128], %46 {strides = array<i32>} : memref<16x256xf32, #tpu.memory_space<vmem>>, vector<16x128xf32>,
    %c0_21 = arith.constant 0 : index
    %c0_22 = arith.constant 0 : index
    %48 = vector.load %arg5[%c0_21, %c0_22] : memref<16x256xf32, #tpu.memory_space<vmem>>, vector<16x128xf32>
    %cst_23 = arith.constant 0.120078377 : f32
    %49 = vector.broadcast %cst_23 : f32 to vector<16x128xf32>
    %50 = arith.mulf %49, %48 : vector<16x128xf32>
    %c0_24 = arith.constant 0 : index
    %c1 = arith.constant 1 : index
    %51 = vector.load %arg5[%c0_24, %c1] : memref<16x256xf32, #tpu.memory_space<vmem>>, vector<16x128xf32>
    %cst_25 = arith.constant 0.233880758 : f32
    %52 = vector.broadcast %cst_25 : f32 to vector<16x128xf32>
    %53 = arith.mulf %52, %51 : vector<16x128xf32>
    %c0_26 = arith.constant 0 : index
    %c2 = arith.constant 2 : index
    %54 = vector.load %arg5[%c0_26, %c2] : memref<16x256xf32, #tpu.memory_space<vmem>>, vector<16x128xf32>
    %cst_27 = arith.constant 0.292081714 : f32
    %55 = vector.broadcast %cst_27 : f32 to vector<16x128xf32>
    %56 = arith.mulf %55, %54 : vector<16x128xf32>
    %57 = arith.addf %50, %56 : vector<16x128xf32>
    %c0_28 = arith.constant 0 : index
    %c3 = arith.constant 3 : index
    %58 = vector.load %arg5[%c0_28, %c3] : memref<16x256xf32, #tpu.memory_space<vmem>>, vector<16x128xf32>
    %cst_29 = arith.constant 0.233880758 : f32
    %59 = vector.broadcast %cst_29 : f32 to vector<16x128xf32>
    %60 = arith.mulf %59, %58 : vector<16x128xf32>
    %61 = arith.addf %53, %60 : vector<16x128xf32>
    %c0_30 = arith.constant 0 : index
    %c4 = arith.constant 4 : index
    %62 = vector.load %arg5[%c0_30, %c4] : memref<16x256xf32, #tpu.memory_space<vmem>>, vector<16x128xf32>
    %cst_31 = arith.constant 0.120078377 : f32
    %63 = vector.broadcast %cst_31 : f32 to vector<16x128xf32>
    %64 = arith.mulf %63, %62 : vector<16x128xf32>
    %65 = arith.addf %57, %64 : vector<16x128xf32>
    %66 = arith.addf %65, %61 : vector<16x128xf32>
    %c0_32 = arith.constant 0 : index
    %c0_33 = arith.constant 0 : index
    %c0_34 = arith.constant 0 : index
    %67 = vector.load %arg3[%c0_32, %c0_33, %c0_34] : memref<1x16x128xf32, #tpu.memory_space<vmem>>, vector<1x16x128xf32>
    %68 = vector.shape_cast %67 : vector<1x16x128xf32> to vector<16x128xf32>
    %69 = vector.shape_cast %66 : vector<16x128xf32> to vector<1x16x128xf32>
    tpu.vector_store %arg3[%c0_32, %c0_33, %c0_34], %69 {strides = array<i32>} : memref<1x16x128xf32, #tpu.memory_space<vmem>>, vector<1x16x128xf32>,
    return
  }
  func.func @transform_1(%arg0: i32, %arg1: i32) -> (i32, i32, i32) {
    %c0_i32 = arith.constant 0 : i32
    %c0_i32_0 = arith.constant 0 : i32
    return %arg0, %arg1, %c0_i32 : i32, i32, i32
  }
}

</mosaic_0001>

<bundles_post_ra>
// kernel: tpu_custom_call.1
= control target key start
LH: loop header
LB: loop body
LE: loop exit
PB: predicated region body
PF: predicated region fallthrough
CT: control target
= control target key end

     0   :  { %6 = vsyncpa [#allocation6], 0  ;;  %s706_s0 = inlined_call_operand.hbm [shape: f32[3,24,128], index: 0, kind: input, shape index: {}]   ;;  %s707_s1 = inlined_call_operand.hbm [shape: f32[3,16,128], index: 1, kind: output, shape index: {}]  }
   0x1   :  { %8 = vsyncpa [#allocation6 + $0x1], 0  ;;  %s586_s6 = smov 0   ;;  %s588_s7 = smov 0  }
   0x2   :  { %s590_s8 = smov 0   ;;  %s592_s9 = smov 0  }
   0x3 LB: > { %s23_s10 = sadd.s32 1, %s562_s8  ;;  %s397_s11 = sadd.s32 4294967295, %s566_s9   ;;  %s566_s9 = sphi %s592_s9, %s14_s9   ;;  %s562_s8 = sphi %s590_s8, %s712_s8   ;;  %s558_s7 = sphi %s588_s7, %s711_s7   ;;  %s554_s6 = sphi %s586_s6, %s710_s6  }
   0x4   : > { %p25_p0 = scmp.ge.s32.totalorder %s23_s10, 3  ;;  %p41_p1 = scmp.ne.s32.totalorder %s558_s7, %s554_s6 }
   0x5   : > { %s32_s12 = sadd.s32 1, %s558_s7  ;;  %p42_p2 = scmp.eq.s32.totalorder %s397_s11, 2 }
   0x6   : > { %s714_s10 = smov (%p25_p0, %s23_s10), 0  ;;  %p36_p3 = scmp.eq.s32.totalorder %s566_s9, 2 }
   0x7   : > { %s27_s13 = ssub.s32 %s562_s8, %s714_s10  ;;  %p616_p6 = por %p42_p2, %p41_p1 }
   0x8   : > { %p30_p4 = scmp.eq.s32.totalorder %s27_s13, 0  ;;  %p398_p5 = scmp.ne.s32.totalorder %s27_s13, 0 }
   0x9   : > { %p399_p8 = scmp.ge.s32.totalorder %s566_s9, 3 }
   0xa   : > { %s621_s15 = scalar_select %p30_p4, %s558_s7, %s32_s12  }
   0xb   : > { %p623_p7 = por %p398_p5, %p36_p3  ;;  %51 = sbr.rel (%p399_p8) target bundleno = 315 (0x13b), region = 12 }
   0xc   : > { %s56_s17 = sand.u32 (!%p399_p8), 1, %s558_s7   ;;  %s410_s18 = smul.u32 (!%p399_p8), 384, %s562_s8 }
   0xd   : > { %s400_s19 = sshll.u32 (!%p399_p8), %s56_s17, 4  ;;  %s568_s23 = smov (!%p399_p8), [#allocation2]  }
   0xe   : > { %s80_s22 = scalar_lea.hbm (!%p399_p8), %s706_s0, %s410_s18  ;;  %s91_s24 = sshll.u32 (!%p399_p8), %s568_s23, 4  ;;  %s92_s24 = int_to_ptr.vmem [resolvable:$true] %s91_s24 }
   0xf   : > { %s478_s25 = scalar_lea.hbm (!%p399_p8), %s80_s22, 384  ;;  %s480_s28 = scalar_lea.hbm (!%p399_p8), %s706_s0, 1152 }
  0x10   : > { %p479_p9 = scmp.ne.s32.totalorder (!%p399_p8), %s80_s22, %s478_s25  ;;  %p481_p10 = scmp.lt.u32.totalorder (!%p399_p8), %s80_s22, %s706_s0 }
  0x11   : > { %p482_p11 = scmp.lt.u32.totalorder (!%p399_p8), %s480_s28, %s478_s25  ;;  %p484_p13 = scmp.lt.u32.totalorder (!%p399_p8), %s478_s25, %s80_s22 }
  0x13   : > { %p483_p12 = por %p482_p11, %p481_p10 }
  0x15   : > { %p485_p0 = por %p484_p13, %p483_p12 }
  0x17   : > { %p486_p1 = pnand %p485_p0, %p479_p9 }
  0x19   : > { %489 = shalt.err (!%p486_p1)  }
  0x1a   : > { %s490_s2 = scalar_lea.vmem %s92_s24, 384  ;;  %s494_s3 = scalar_lea.vmem %s92_s24, 768 }
  0x1b   : > { %p491_p2 = scmp.ne.s32.totalorder %s92_s24, %s490_s2  ;;  %p495_p3 = scmp.lt.s32.totalorder %s92_s24, %s92_s24 }
  0x1c   : > { %p496_p4 = scmp.lt.s32.totalorder %s494_s3, %s490_s2 }
  0x1e   : > { %p497_p5 = por %p496_p4, %p495_p3 }
  0x20   : > { %p498_p8 = pnand %p497_p5, %p491_p2 }
  0x22   : > { %501 = shalt.err (!%p498_p8)  }
  0x23   : > { %94 = dma.hbm_to_vmem [thread:$0]  %s80_s22, 384, %s92_s24, [#allocation4] }
  0x24   : > { %s641_s4 = scalar_lea.vmem [#allocation5], %s400_s19 }
  0x25   : > { %546 = dma.done.wait [#allocation4], 384 }
  0x26   : > { %547 = vsyncadd [#allocation4], 4294966912  ;;  %v126_v0 = vld [vmem:[#allocation2] sm:$0xff]  ;;  %v127_v1 = vld [vmem:[#allocation2 + $0x8] sm:$0xff]  ;;  %vm140_vm0 = vcmask 1045504   ;;  %vm168_vm1 = vcmask 1043456  }
  0x27   : > { %v128_v2 = vld [vmem:[#allocation2 + $0x10] sm:$0xff]  ;;  %v129_v3 = vmul.f32 0.12007838, %v126_v0  ;;  %v130_v4 = vmul.f32 0.12007838, %v127_v1  ;;  %vm181_vm2 = vcmask 1046528  }
  0x28   : > { %v131_v5 = vmul.f32 0.23388076, %v126_v0  ;;  %v132_v6 = vmul.f32 0.23388076, %v127_v1  ;;  %v133_v7 = vmul.f32 0.23388076, %v128_v2 }
  0x29   : > { %v134_v8 = vmul.f32 0.2920817, %v126_v0  ;;  %v135_v9 = vmul.f32 0.2920817, %v127_v1  ;;  %v169_v11 = vrot.slane %v129_v3, 4  ;;  %v170_v12 = vrot.slane %v130_v4, 4 }
  0x2a   : > { %v153_v10 = vrot.slane %v131_v5, 2  ;;  %v154_v14 = vrot.slane %v132_v6, 2  ;;  %v156_v15 = vrot.slane %v133_v7, 2  ;;  %v136_v16 = vmul.f32 0.2920817, %v128_v2  ;;  %s569_s5 = smov 126  }
  0x2b   : > { %v141_v13 = vrot.slane %v134_v8, 2  ;;  %v142_v17 = vrot.slane %v135_v9, 2  ;;  %v171_v18 = vsel %vm168_vm1, %v169_v11, %v170_v12  ;;  %v164_v19 = vmul.f32 0.12007838, %v128_v2  ;;  %s571_s11 = smov 124   ;;  %s572_s12 = smov 127  }
  0x2c   : > { %v155_v20 = vsel %vm140_vm0, %v153_v10, %v154_v14  ;;  %v157_v21 = vsel %vm140_vm0, %v154_v14, %v156_v15  ;;  %v144_v22 = vrot.slane %v136_v16, 2  ;;  %v163_v23 = vadd.f32 %v156_v15, %v133_v7  ;;  %s411_s13 = sshll.u32 %s562_s8, 8  ;;  %s312_s18 = sshll.u32 %s641_s4, 4  ;;  %s661_s18 = int_to_ptr.vmem [resolvable:$true] %s312_s18 }
  0x2d   : > { %v143_v24 = vsel %vm140_vm0, %v141_v13, %v142_v17  ;;  %v161_v25 = vadd.f32 %v155_v20, %v131_v5  ;;  %v162_v26 = vadd.f32 %v157_v21, %v132_v6  ;;  %v172_v27 = vrot.slane %v164_v19, 4  ;;  %s659_s21 = scalar_lea.hbm %s707_s1, %s411_s13  ;;  %s666_s8 = scalar_lea.sflag [#allocation6], %s56_s17 }
  0x2e   : > { %v148_v28 = vadd.f32 %v143_v24, %v129_v3  ;;  %v145_v29 = vsel %vm140_vm0, %v142_v17, %v144_v22  ;;  %v185_v30 = vrot.slane %v163_v23, 1  ;;  %v570_v43 = vmov 0.0   ;;  %s502_s22 = scalar_lea.vmem %s661_s18, 256  ;;  %s573_s23 = smov [#allocation5]  }
  0x2f   : > { %v182_v31 = vrot.slane %v161_v25, 1  ;;  %v183_v32 = vrot.slane %v162_v26, 1  ;;  %v149_v33 = vadd.f32 %v145_v29, %v130_v4  ;;  %v173_v34 = vsel %vm168_vm1, %v170_v12, %v172_v27  ;;  %p503_p9 = scmp.ne.s32.totalorder %s661_s18, %s502_s22  ;;  %s506_s24 = sshll.u32 %s573_s23, 4  ;;  %s507_s24 = int_to_ptr.vmem [resolvable:$false] %s506_s24 }
  0x30   : > { %v176_v35 = vadd.f32 %v171_v18, %v148_v28  ;;  %vm223_vm3 = vcmask 1031168   ;;  %vm268_vm4 = vcmask 1014784   ;;  %vm287_vm5 = vcmask 1039360   ;;  %s508_s25 = scalar_lea.vmem %s507_s24, 512  ;;  %p509_p12 = scmp.lt.s32.totalorder %s661_s18, %s507_s24 }
  0x31   : > { %v184_v36 = vsel %vm181_vm2, %v182_v31, %v183_v32  ;;  %v177_v37 = vadd.f32 %v173_v34, %v149_v33  ;;  %v186_v38 = vsel %vm181_vm2, %v183_v32, %v185_v30  ;;  %p504_p10 = pnand %p503_p9, %p623_p7  ;;  %p510_p13 = scmp.lt.s32.totalorder %s508_s25, %s502_s22 }
  0x32   : > { %v189_v39 = vadd.f32 %v184_v36, %v176_v35 }
  0x33   : > { %v190_v40 = vadd.f32 %v186_v38, %v177_v37  ;;  %p505_p11 = pneg %p504_p10  ;;  %p511_p0 = por %p510_p13, %p509_p12 }
  0x34   : > { %v203_v41 = vmul.f32 0.23388076, %v189_v39  ;;  %v207_v44 = vmul.f32 0.2920817, %v189_v39  ;;  %v197_v45 = vmul.f32 0.12007838, %v189_v39 }
  0x35   : > { %v205_v42 = vmul.f32 0.23388076, %v190_v40  ;;  %v209_v46 = vmul.f32 0.2920817, %v190_v40  ;;  %v198_v47 = vmul.f32 0.12007838, %v190_v40  ;;  %p512_p1 = pnand %p511_p0, %p505_p11 }
  0x36   : > { %234 = vrot.lane.b32.xlu0 %v203_v41, %s569_s5 }
  0x37   : > { %238 = vrot.lane.b32.xlu1 %v205_v42, %s569_s5 }
  0x3a   : > { %459 = vrot.lane.b32.xlu0 %v570_v43, %s569_s5 }
  0x3b   : > { %469 = vrot.lane.b32.xlu1 %v570_v43, %s571_s11 }
  0x3e   : > { %464 = vrot.lane.b32.xlu0 %v570_v43, %s569_s5 }
  0x3f   : > { %215 = vrot.lane.b32.xlu1 %v207_v44, %s569_s5 }
  0x42   : > { %260 = vrot.lane.b32.xlu0 %v197_v45, %s571_s11 }
  0x43   : > { %219 = vrot.lane.b32.xlu1 %v209_v46, %s569_s5 }
  0x46   : > { %264 = vrot.lane.b32.xlu0 %v198_v47, %s571_s11 }
  0xa8   : > { %v235_v48 = vpop.permute.xlu0 %234 }
  0xa9   : > { %v239_v52 = vpop.permute.xlu1 %238 }
  0xac   : > { %v460_v49 = vpop.permute.xlu0 %459 }
  0xad   : > { %v462_v50 = vunpack.i.h.bf16 %v460_v49  ;;  %v461_v51 = vunpack.i.l.bf16 %v460_v49  ;;  %474 = vrot.lane.b32.xlu0 %v460_v49, %s572_s12  ;;  %v470_v57 = vpop.permute.xlu1 %469 }
  0xae   : > { %v471_v63 = vunpack.i.l.bf16 %v470_v57  ;;  %v472_v3 = vunpack.i.h.bf16 %v470_v57 }
  0xaf   : > { %v242_v53 = vsel %vm223_vm3, %v235_v48, %v461_v51  ;;  %v243_v55 = vsel %vm223_vm3, %v239_v52, %v462_v50 }
  0xb0   : > { %v248_v54 = vadd.f32 %v242_v53, %v203_v41  ;;  %v250_v56 = vadd.f32 %v243_v55, %v205_v42  ;;  %v465_v58 = vpop.permute.xlu0 %464 }
  0xb1   : > { %v216_v59 = vpop.permute.xlu1 %215  ;;  %v466_v61 = vunpack.i.l.bf16 %v465_v58  ;;  %v467_v62 = vunpack.i.h.bf16 %v465_v58 }
  0xb2   : > { %279 = vrot.lane.b32.xlu1 %v248_v54, %s572_s12 }
  0xb3   : > { %v224_v0 = vsel %vm223_vm3, %v216_v59, %v466_v61 }
  0xb4   : > { %v261_v60 = vpop.permute.xlu0 %260  ;;  %v228_v4 = vadd.f32 %v224_v0, %v197_v45 }
  0xb5   : > { %v220_v1 = vpop.permute.xlu1 %219  ;;  %v269_v6 = vsel %vm268_vm4, %v261_v60, %v471_v63 }
  0xb6   : > { %283 = vrot.lane.b32.xlu1 %v250_v56, %s572_s12  ;;  %v225_v5 = vsel %vm223_vm3, %v220_v1, %v467_v62  ;;  %v273_v11 = vadd.f32 %v269_v6, %v228_v4 }
  0xb7   : > { %v229_v8 = vadd.f32 %v225_v5, %v198_v47 }
  0xb8   : > { %v265_v2 = vpop.permute.xlu0 %264 }
  0xb9   : > { %v270_v12 = vsel %vm268_vm4, %v265_v2, %v472_v3 }
  0xba   : > { %v274_v16 = vadd.f32 %v270_v12, %v229_v8 }
 0x11f   : > { %v475_v7 = vpop.permute.xlu0 %474 }
 0x120   : > { %v476_v9 = vunpack.i.l.bf16 %v475_v7  ;;  %v477_v14 = vunpack.i.h.bf16 %v475_v7 }
 0x124   : > { %v280_v10 = vpop.permute.xlu1 %279 }
 0x125   : > { %v288_v13 = vsel %vm287_vm5, %v280_v10, %v476_v9 }
 0x126   : > { %v292_v15 = vadd.f32 %v288_v13, %v273_v11 }
 0x128   : > { %v284_v17 = vpop.permute.xlu1 %283  ;;  %294 = vst [vmem:[%s641_s4] sm:$0xff] %v292_v15 }
 0x129   : > { %v289_v18 = vsel %vm287_vm5, %v284_v17, %v477_v14 }
 0x12a   : > { %v293_v19 = vadd.f32 %v289_v18, %v274_v16 }
 0x12c   : > { %295 = vst [vmem:[%s641_s4 + $0x8] sm:$0xff] %v293_v19 }
 0x12d   : > { %515 = shalt.err (!%p512_p1)
}
 0x12e   : > { %s516_s17 = scalar_lea.hbm %s659_s21, 256  ;;  %s520_s28 = scalar_lea.hbm %s707_s1, 768 }
 0x12f   : > { %p517_p2 = scmp.ne.s32.totalorder %s659_s21, %s516_s17  ;;  %p521_p5 = scmp.lt.u32.totalorder %s659_s21, %s707_s1 }
 0x130   : > { %p522_p8 = scmp.lt.u32.totalorder %s520_s28, %s516_s17  ;;  %p524_p10 = scmp.lt.u32.totalorder %s516_s17, %s659_s21 }
 0x131   : > { %p518_p3 = pnand %p517_p2, %p623_p7 }
 0x132   : > { %p523_p9 = por %p522_p8, %p521_p5 }
 0x133   : > { %p519_p4 = pneg %p518_p3 }
 0x134   : > { %p525_p11 = por %p524_p10, %p523_p9 }
 0x136   : > { %p526_p12 = pnand %p525_p11, %p519_p4 }
 0x138   : > { %529 = shalt.err (!%p526_p12)
}
 0x139   : > { %s574_s2 = smov 128   ;;  %s575_s3 = smov 8  }
 0x13a   : > { %412 = dma.vmem_to_hbm [thread:$0]  (%p623_p7), %s661_s18, 256, %s659_s21, %s666_s8, %s574_s2, %s574_s2, %s575_s3  }
 0x13b PF: > { %p418_p13 = scmp.ge.s32.totalorder %s566_s9, 1  ;;  %s327_s4 = sand.u32 1, %s554_s6  }
 0x13c   : > { %s328_s5 = scalar_lea.sflag [#allocation6], %s327_s4 }
 0x13d   : > { %p415_p0 = pnand %p418_p13, %p616_p6 }
 0x13f   : > { %549 = dma.done.wait (!%p415_p0), %s328_s5, 256  }
 0x140   : > { %551 = vsyncadd (!%p415_p0), %s328_s5, 4294967040  ;;  %s14_s9 = sadd.s32 1, %s566_s9   ;;  %s710_s6 = smov %s558_s7 }
 0x141   : > { %p11_p1 = scmp.ge.s32.totalorder %s14_s9, 4   ;;  %s711_s7 = smov %s621_s15 }
 0x142   : > { %s712_s8 = smov %s714_s10 }
 0x143   :  { %13 = sbr.rel (!%p11_p1) target bundleno = 3 (0x3), region = 69 }
 0x14a   :  { %333 = vsyncpa [#allocation6], 1 }
 0x14b   :  { %335 = vsyncpa [#allocation6 + $0x1], 1 }
 0x14c   :  { %336 = vsyncmov [#allocation4] }
 0x14f   :  { %s337_s14 = vpop.sfrf %336 }
 0x150   :  { %p408_p6 = scmp.ne.s32.totalorder %s337_s14, 0 }
 0x152   :  { %341 = shalt.err (%p408_p6)  }
 0x153   :  { %343 = vsyncmov [#allocation4 + $0x1] }
 0x156   :  { %s344_s16 = vpop.sfrf %343 }
 0x157   :  { %p409_p7 = scmp.ne.s32.totalorder %s344_s16, 0 }
 0x159   :  { %348 = shalt.err (%p409_p7)  }

</bundles_post_ra>
